<compile_context>
chip_gen: v7x
topology: tpu7x:2x2x1
jax: 0.10.0
libtpu: 0.0.40
codegen_flags: <defaults>
</compile_context>

<pallas_src>
import functools
import jax
import jax.numpy as jnp
from jax import lax
from jax.experimental import pallas as pl
from jax.experimental.pallas import tpu as pltpu


def _gchw_kernel(x_ref, w_ref, b_ref, o_ref, *, gks, H, W, nc_h):
    """One grid step = (batch b, channel-block cb).

    x_ref/o_ref: (c_blk, H*W) -- channels on sublanes, flattened H*W on lanes.
    w_ref:       (c_blk, gks) -- per-channel depthwise taps (VMEM).
    b_ref:       (c_blk, 1)   -- per-channel bias (VMEM).
    Channel blocks with cb <  nc_h belong to the H-direction conv half,
    channel blocks with cb >= nc_h belong to the W-direction conv half.
    """
    cb = pl.program_id(1)
    pad = gks // 2
    HW = H * W
    c_blk = x_ref.shape[0]

    x = x_ref[...].astype(jnp.float32)
    w = w_ref[...].astype(jnp.float32)
    b = b_ref[...].astype(jnp.float32)

    # Flat spatial position of every lane (broadcast over channel sublanes).
    p = lax.broadcasted_iota(jnp.int32, (1, HW), 1)

    def accumulate(offsets, masks):
        # Static-unrolled MAC loop over taps (gks is small, typically 7).
        # TODO(synk): for very large gks switch to lax.fori_loop(..., unroll=True).
        acc = jnp.zeros((c_blk, HW), jnp.float32)
        for k in range(gks):
            s = offsets[k]                      # source offset: shifted[p] = x[p + s]
            r = (-s) % HW                       # jnp.roll convention: roll(x, r)[p] = x[p - r]
            shifted = x if r == 0 else pltpu.roll(x, shift=r, axis=1)
            m = masks[k]
            term = shifted if m is None else jnp.where(m, shifted, 0.0)
            acc = acc + term * w[:, k:k + 1]    # per-channel tap, broadcast along lanes
        return acc

    @pl.when(cb < nc_h)
    def _():
        # Depthwise (gks, 1) conv: taps move along H => flat shifts of multiples of W,
        # zero-padded at the top/bottom image edges (== flat array bounds).
        offs = [(k - pad) * W for k in range(gks)]
        msks = [None if o == 0 else ((p + o >= 0) & (p + o < HW)) for o in offs]
        o_ref[...] = (accumulate(offs, msks) + b).astype(o_ref.dtype)

    @pl.when(cb >= nc_h)
    def _():
        # Depthwise (1, gks) conv: taps move along W => flat shifts of +-1..+-pad,
        # masked where the shift would cross a row (image-column) boundary.
        if W & (W - 1) == 0:
            w_idx = jnp.bitwise_and(p, W - 1)
        else:
            w_idx = lax.rem(p, W)
        offs = [k - pad for k in range(gks)]
        msks = [None if o == 0 else ((w_idx + o >= 0) & (w_idx + o < W)) for o in offs]
        o_ref[...] = (accumulate(offs, msks) + b).astype(o_ref.dtype)


def _pick_c_blk(dim_half, HW, itemsize=4, block_budget_bytes=2 << 20):
    """Largest multiple of 8 that divides dim_half and keeps one (c_blk, H*W) f32 block
    under the budget (double-buffered in+out then stays well inside scoped VMEM)."""
    for cand in range(dim_half, 0, -8):
        if dim_half % cand == 0 and cand * HW * itemsize <= block_budget_bytes:
            return cand
    return 8


def gchw_conv(x, wh, bh, ww, bw, gks):
    """x: (B, C, H, W). wh/ww: (C//2, gks) depthwise taps. bh/bw: (C//2,) biases."""
    B, C, H, W = x.shape
    assert C % 2 == 0, "channel count must be even (split into H/W halves)"
    dim = C // 2
    assert gks % 2 == 1, "global_kernel_size must be odd for shape-preserving padding"
    # TODO(synk): support per-half channel counts not divisible by 8 (would need channel padding).
    assert dim % 8 == 0, "per-half channel count must be a multiple of 8 (TPU sublane tiling)"
    HW = H * W

    c_blk = _pick_c_blk(dim, HW)
    nc_h = dim // c_blk          # channel blocks per half
    nblk = 2 * nc_h              # total channel blocks (H half first, then W half)

    # Free reshape: flatten H*W onto the lane axis. Weights/bias of both halves are
    # concatenated channel-wise (tiny arrays) so one kernel writes the full output
    # and no output concat / input pad passes are needed.
    x_flat = x.reshape(B, C, HW)
    w_all = jnp.concatenate([wh, ww], axis=0).astype(jnp.float32)               # (C, gks)
    b_all = jnp.concatenate([bh, bw], axis=0).astype(jnp.float32)[:, None]      # (C, 1)

    kernel = functools.partial(_gchw_kernel, gks=gks, H=H, W=W, nc_h=nc_h)

    out_flat = pl.pallas_call(
        kernel,
        out_shape=jax.ShapeDtypeStruct((B, C, HW), x.dtype),
        grid_spec=pltpu.PrefetchScalarGridSpec(
            num_scalar_prefetch=0,
            grid=(B, nblk),
            in_specs=[
                pl.BlockSpec((None, c_blk, HW), lambda b, cb: (b, cb, 0)),   # x tile
                pl.BlockSpec((c_blk, gks), lambda b, cb: (cb, 0)),           # taps for this block
                pl.BlockSpec((c_blk, 1), lambda b, cb: (cb, 0)),             # bias for this block
            ],
            out_specs=pl.BlockSpec((None, c_blk, HW), lambda b, cb: (b, cb, 0)),
        ),
        compiler_params=pltpu.CompilerParams(
            dimension_semantics=("parallel", "parallel"),   # both axes shardable across TCs
            vmem_limit_bytes=32 << 20,                      # safe on v5e/v6e (128 MiB) and v7x (64 MiB)
        ),
    )(x_flat, w_all, b_all)

    return out_flat.reshape(B, C, H, W)


def gchw_conv_ref(x, wh, bh, ww, bw, gks):
    """Pure-JAX reference using grouped conv (mirrors nn.Conv2d with groups=dim)."""
    B, C, H, W = x.shape
    dim = C // 2
    pad = gks // 2
    x_H, x_W = x[:, :dim], x[:, dim:]
    wH = wh.reshape(dim, 1, gks, 1)  # OIHW with groups=dim
    wW = ww.reshape(dim, 1, 1, gks)
    yH = lax.conv_general_dilated(
        x_H, wH, window_strides=(1, 1), padding=((pad, pad), (0, 0)),
        dimension_numbers=("NCHW", "OIHW", "NCHW"), feature_group_count=dim,
    ) + bh.reshape(1, dim, 1, 1)
    yW = lax.conv_general_dilated(
        x_W, wW, window_strides=(1, 1), padding=((0, 0), (pad, pad)),
        dimension_numbers=("NCHW", "OIHW", "NCHW"), feature_group_count=dim,
    ) + bw.reshape(1, dim, 1, 1)
    return jnp.concatenate([yH, yW], axis=1)


if __name__ == "__main__":
    B, C, H, W = 2, 32, 16, 16        # module dim arg = 32 -> 16 channels per half (multiple of 8)
    gks = 7                           # global_kernel_size (odd)
    dim_half = C // 2

    key = jax.random.PRNGKey(0)
    kx, kwh, kbh, kww, kbw = jax.random.split(key, 5)
    x = jax.random.normal(kx, (B, C, H, W), jnp.float32)
    wh = jax.random.normal(kwh, (dim_half, gks), jnp.float32) * 0.1   # gch_conv.weight (dim,1,gks,1)
    bh = jax.random.normal(kbh, (dim_half,), jnp.float32) * 0.1       # gch_conv.bias
    ww = jax.random.normal(kww, (dim_half, gks), jnp.float32) * 0.1   # gcw_conv.weight (dim,1,1,gks)
    bw = jax.random.normal(kbw, (dim_half,), jnp.float32) * 0.1       # gcw_conv.bias

    out = gchw_conv(x, wh, bh, ww, bw, gks)
    out = jax.block_until_ready(out)

    ref = gchw_conv_ref(x, wh, bh, ww, bw, gks)
    assert out.shape == (B, C, H, W)
    assert jnp.allclose(out, ref, atol=1e-5, rtol=1e-5), "mismatch vs grouped-conv reference"

    print("KERNEL_OK")
</pallas_src>

<mosaic_0001>
module attributes {stable_mosaic.version = 11 : i64} {
  func.func @_gchw_kernel(%arg0: i32, %arg1: i32, %arg2: memref<1x16x256xf32, #tpu.memory_space<vmem>>, %arg3: memref<16x7xf32, #tpu.memory_space<vmem>>, %arg4: memref<16x1xf32, #tpu.memory_space<vmem>>, %arg5: memref<1x16x256xf32, #tpu.memory_space<vmem>>) attributes {dimension_semantics = [#tpu.dimension_semantics<parallel>, #tpu.dimension_semantics<parallel>], iteration_bounds = array<i64: 2, 2>, scalar_prefetch = 0 : i64, scratch_operands = 0 : i64, tpu.core_type = #tpu.core_type<tc>, window_params = [{transform_indices = @transform_0, window_bounds = array<i64: 1, 16, 256>}, {transform_indices = @transform_1, window_bounds = array<i64: 16, 7>}, {transform_indices = @transform_2, window_bounds = array<i64: 16, 1>}, {transform_indices = @transform_3, window_bounds = array<i64: 1, 16, 256>}]} {
    %c0 = arith.constant 0 : index
    %c0_0 = arith.constant 0 : index
    %c0_1 = arith.constant 0 : index
    %0 = vector.load %arg2[%c0, %c0_0, %c0_1] : memref<1x16x256xf32, #tpu.memory_space<vmem>>, vector<1x16x256xf32>
    %1 = vector.shape_cast %0 : vector<1x16x256xf32> to vector<16x256xf32>
    %c0_2 = arith.constant 0 : index
    %c0_3 = arith.constant 0 : index
    %2 = vector.load %arg3[%c0_2, %c0_3] : memref<16x7xf32, #tpu.memory_space<vmem>>, vector<16x7xf32>
    %c0_4 = arith.constant 0 : index
    %c0_5 = arith.constant 0 : index
    %3 = vector.load %arg4[%c0_4, %c0_5] : memref<16x1xf32, #tpu.memory_space<vmem>>, vector<16x1xf32>
    %4 = tpu.iota {dimensions = array<i32: 1>} : vector<1x256xi32>
    %c1_i32 = arith.constant 1 : i32
    %5 = arith.cmpi slt, %arg1, %c1_i32 : i32
    %6 = arith.extui %5 : i1 to i32
    %c0_i32 = arith.constant 0 : i32
    %7 = arith.cmpi ne, %6, %c0_i32 : i32
    scf.if %7 {
      %c-48_i32 = arith.constant -48 : i32
      %11 = vector.broadcast %c-48_i32 : i32 to vector<1x256xi32>
      %12 = arith.addi %4, %11 : vector<1x256xi32>
      %c0_i32_8 = arith.constant 0 : i32
      %13 = vector.broadcast %c0_i32_8 : i32 to vector<1x256xi32>
      %14 = arith.cmpi sge, %12, %13 : vector<1x256xi32>
      %c-48_i32_9 = arith.constant -48 : i32
      %15 = vector.broadcast %c-48_i32_9 : i32 to vector<1x256xi32>
      %16 = arith.addi %4, %15 : vector<1x256xi32>
      %c256_i32 = arith.constant 256 : i32
      %17 = vector.broadcast %c256_i32 : i32 to vector<1x256xi32>
      %18 = arith.cmpi slt, %16, %17 : vector<1x256xi32>
      %19 = arith.andi %14, %18 : vector<1x256xi1>
      %c-32_i32 = arith.constant -32 : i32
      %20 = vector.broadcast %c-32_i32 : i32 to vector<1x256xi32>
      %21 = arith.addi %4, %20 : vector<1x256xi32>
      %c0_i32_10 = arith.constant 0 : i32
      %22 = vector.broadcast %c0_i32_10 : i32 to vector<1x256xi32>
      %23 = arith.cmpi sge, %21, %22 : vector<1x256xi32>
      %c-32_i32_11 = arith.constant -32 : i32
      %24 = vector.broadcast %c-32_i32_11 : i32 to vector<1x256xi32>
      %25 = arith.addi %4, %24 : vector<1x256xi32>
      %c256_i32_12 = arith.constant 256 : i32
      %26 = vector.broadcast %c256_i32_12 : i32 to vector<1x256xi32>
      %27 = arith.cmpi slt, %25, %26 : vector<1x256xi32>
      %28 = arith.andi %23, %27 : vector<1x256xi1>
      %c-16_i32 = arith.constant -16 : i32
      %29 = vector.broadcast %c-16_i32 : i32 to vector<1x256xi32>
      %30 = arith.addi %4, %29 : vector<1x256xi32>
      %c0_i32_13 = arith.constant 0 : i32
      %31 = vector.broadcast %c0_i32_13 : i32 to vector<1x256xi32>
      %32 = arith.cmpi sge, %30, %31 : vector<1x256xi32>
      %c-16_i32_14 = arith.constant -16 : i32
      %33 = vector.broadcast %c-16_i32_14 : i32 to vector<1x256xi32>
      %34 = arith.addi %4, %33 : vector<1x256xi32>
      %c256_i32_15 = arith.constant 256 : i32
      %35 = vector.broadcast %c256_i32_15 : i32 to vector<1x256xi32>
      %36 = arith.cmpi slt, %34, %35 : vector<1x256xi32>
      %37 = arith.andi %32, %36 : vector<1x256xi1>
      %c16_i32 = arith.constant 16 : i32
      %38 = vector.broadcast %c16_i32 : i32 to vector<1x256xi32>
      %39 = arith.addi %4, %38 : vector<1x256xi32>
      %c0_i32_16 = arith.constant 0 : i32
      %40 = vector.broadcast %c0_i32_16 : i32 to vector<1x256xi32>
      %41 = arith.cmpi sge, %39, %40 : vector<1x256xi32>
      %c16_i32_17 = arith.constant 16 : i32
      %42 = vector.broadcast %c16_i32_17 : i32 to vector<1x256xi32>
      %43 = arith.addi %4, %42 : vector<1x256xi32>
      %c256_i32_18 = arith.constant 256 : i32
      %44 = vector.broadcast %c256_i32_18 : i32 to vector<1x256xi32>
      %45 = arith.cmpi slt, %43, %44 : vector<1x256xi32>
      %46 = arith.andi %41, %45 : vector<1x256xi1>
      %c32_i32 = arith.constant 32 : i32
      %47 = vector.broadcast %c32_i32 : i32 to vector<1x256xi32>
      %48 = arith.addi %4, %47 : vector<1x256xi32>
      %c0_i32_19 = arith.constant 0 : i32
      %49 = vector.broadcast %c0_i32_19 : i32 to vector<1x256xi32>
      %50 = arith.cmpi sge, %48, %49 : vector<1x256xi32>
      %c32_i32_20 = arith.constant 32 : i32
      %51 = vector.broadcast %c32_i32_20 : i32 to vector<1x256xi32>
      %52 = arith.addi %4, %51 : vector<1x256xi32>
      %c256_i32_21 = arith.constant 256 : i32
      %53 = vector.broadcast %c256_i32_21 : i32 to vector<1x256xi32>
      %54 = arith.cmpi slt, %52, %53 : vector<1x256xi32>
      %55 = arith.andi %50, %54 : vector<1x256xi1>
      %c48_i32 = arith.constant 48 : i32
      %56 = vector.broadcast %c48_i32 : i32 to vector<1x256xi32>
      %57 = arith.addi %4, %56 : vector<1x256xi32>
      %c0_i32_22 = arith.constant 0 : i32
      %58 = vector.broadcast %c0_i32_22 : i32 to vector<1x256xi32>
      %59 = arith.cmpi sge, %57, %58 : vector<1x256xi32>
      %c48_i32_23 = arith.constant 48 : i32
      %60 = vector.broadcast %c48_i32_23 : i32 to vector<1x256xi32>
      %61 = arith.addi %4, %60 : vector<1x256xi32>
      %c256_i32_24 = arith.constant 256 : i32
      %62 = vector.broadcast %c256_i32_24 : i32 to vector<1x256xi32>
      %63 = arith.cmpi slt, %61, %62 : vector<1x256xi32>
      %64 = arith.andi %59, %63 : vector<1x256xi1>
      %cst = arith.constant 0.000000e+00 : f32
      %65 = vector.broadcast %cst : f32 to vector<16x256xf32>
      %c48_i32_25 = arith.constant 48 : i32
      %66 = tpu.dynamic_rotate %1 by %c48_i32_25 dim 1 : vector<16x256xf32>, i32 -> vector<16x256xf32>
      %cst_26 = arith.constant 0.000000e+00 : f32
      %67 = vector.shape_cast %19 : vector<1x256xi1> to vector<1x256xi1>
      %68 = vector.broadcast %67 : vector<1x256xi1> to vector<16x256xi1>
      %69 = vector.broadcast %cst_26 : f32 to vector<16x256xf32>
      %70 = arith.select %68, %66, %69 : vector<16x256xi1>, vector<16x256xf32>
      %71 = vector.extract_strided_slice %2 {offsets = [0, 0], sizes = [16, 1], strides = [1, 1]} : vector<16x7xf32> to vector<16x1xf32>
      %72 = vector.broadcast %71 : vector<16x1xf32> to vector<16x256xf32>
      %73 = arith.mulf %70, %72 : vector<16x256xf32>
      %74 = arith.addf %65, %73 : vector<16x256xf32>
      %c32_i32_27 = arith.constant 32 : i32
      %75 = tpu.dynamic_rotate %1 by %c32_i32_27 dim 1 : vector<16x256xf32>, i32 -> vector<16x256xf32>
      %cst_28 = arith.constant 0.000000e+00 : f32
      %76 = vector.shape_cast %28 : vector<1x256xi1> to vector<1x256xi1>
      %77 = vector.broadcast %76 : vector<1x256xi1> to vector<16x256xi1>
      %78 = vector.broadcast %cst_28 : f32 to vector<16x256xf32>
      %79 = arith.select %77, %75, %78 : vector<16x256xi1>, vector<16x256xf32>
      %80 = vector.extract_strided_slice %2 {offsets = [0, 1], sizes = [16, 1], strides = [1, 1]} : vector<16x7xf32> to vector<16x1xf32>
      %81 = vector.broadcast %80 : vector<16x1xf32> to vector<16x256xf32>
      %82 = arith.mulf %79, %81 : vector<16x256xf32>
      %83 = arith.addf %74, %82 : vector<16x256xf32>
      %c16_i32_29 = arith.constant 16 : i32
      %84 = tpu.dynamic_rotate %1 by %c16_i32_29 dim 1 : vector<16x256xf32>, i32 -> vector<16x256xf32>
      %cst_30 = arith.constant 0.000000e+00 : f32
      %85 = vector.shape_cast %37 : vector<1x256xi1> to vector<1x256xi1>
      %86 = vector.broadcast %85 : vector<1x256xi1> to vector<16x256xi1>
      %87 = vector.broadcast %cst_30 : f32 to vector<16x256xf32>
      %88 = arith.select %86, %84, %87 : vector<16x256xi1>, vector<16x256xf32>
      %89 = vector.extract_strided_slice %2 {offsets = [0, 2], sizes = [16, 1], strides = [1, 1]} : vector<16x7xf32> to vector<16x1xf32>
      %90 = vector.broadcast %89 : vector<16x1xf32> to vector<16x256xf32>
      %91 = arith.mulf %88, %90 : vector<16x256xf32>
      %92 = arith.addf %83, %91 : vector<16x256xf32>
      %93 = vector.extract_strided_slice %2 {offsets = [0, 3], sizes = [16, 1], strides = [1, 1]} : vector<16x7xf32> to vector<16x1xf32>
      %94 = vector.broadcast %93 : vector<16x1xf32> to vector<16x256xf32>
      %95 = arith.mulf %1, %94 : vector<16x256xf32>
      %96 = arith.addf %92, %95 : vector<16x256xf32>
      %c240_i32 = arith.constant 240 : i32
      %97 = tpu.dynamic_rotate %1 by %c240_i32 dim 1 : vector<16x256xf32>, i32 -> vector<16x256xf32>
      %cst_31 = arith.constant 0.000000e+00 : f32
      %98 = vector.shape_cast %46 : vector<1x256xi1> to vector<1x256xi1>
      %99 = vector.broadcast %98 : vector<1x256xi1> to vector<16x256xi1>
      %100 = vector.broadcast %cst_31 : f32 to vector<16x256xf32>
      %101 = arith.select %99, %97, %100 : vector<16x256xi1>, vector<16x256xf32>
      %102 = vector.extract_strided_slice %2 {offsets = [0, 4], sizes = [16, 1], strides = [1, 1]} : vector<16x7xf32> to vector<16x1xf32>
      %103 = vector.broadcast %102 : vector<16x1xf32> to vector<16x256xf32>
      %104 = arith.mulf %101, %103 : vector<16x256xf32>
      %105 = arith.addf %96, %104 : vector<16x256xf32>
      %c224_i32 = arith.constant 224 : i32
      %106 = tpu.dynamic_rotate %1 by %c224_i32 dim 1 : vector<16x256xf32>, i32 -> vector<16x256xf32>
      %cst_32 = arith.constant 0.000000e+00 : f32
      %107 = vector.shape_cast %55 : vector<1x256xi1> to vector<1x256xi1>
      %108 = vector.broadcast %107 : vector<1x256xi1> to vector<16x256xi1>
      %109 = vector.broadcast %cst_32 : f32 to vector<16x256xf32>
      %110 = arith.select %108, %106, %109 : vector<16x256xi1>, vector<16x256xf32>
      %111 = vector.extract_strided_slice %2 {offsets = [0, 5], sizes = [16, 1], strides = [1, 1]} : vector<16x7xf32> to vector<16x1xf32>
      %112 = vector.broadcast %111 : vector<16x1xf32> to vector<16x256xf32>
      %113 = arith.mulf %110, %112 : vector<16x256xf32>
      %114 = arith.addf %105, %113 : vector<16x256xf32>
      %c208_i32 = arith.constant 208 : i32
      %115 = tpu.dynamic_rotate %1 by %c208_i32 dim 1 : vector<16x256xf32>, i32 -> vector<16x256xf32>
      %cst_33 = arith.constant 0.000000e+00 : f32
      %116 = vector.shape_cast %64 : vector<1x256xi1> to vector<1x256xi1>
      %117 = vector.broadcast %116 : vector<1x256xi1> to vector<16x256xi1>
      %118 = vector.broadcast %cst_33 : f32 to vector<16x256xf32>
      %119 = arith.select %117, %115, %118 : vector<16x256xi1>, vector<16x256xf32>
      %120 = vector.extract_strided_slice %2 {offsets = [0, 6], sizes = [16, 1], strides = [1, 1]} : vector<16x7xf32> to vector<16x1xf32>
      %121 = vector.broadcast %120 : vector<16x1xf32> to vector<16x256xf32>
      %122 = arith.mulf %119, %121 : vector<16x256xf32>
      %123 = arith.addf %114, %122 : vector<16x256xf32>
      %124 = vector.broadcast %3 : vector<16x1xf32> to vector<16x256xf32>
      %125 = arith.addf %123, %124 : vector<16x256xf32>
      %c0_34 = arith.constant 0 : index
      %c0_35 = arith.constant 0 : index
      %c0_36 = arith.constant 0 : index
      %126 = vector.load %arg5[%c0_34, %c0_35, %c0_36] : memref<1x16x256xf32, #tpu.memory_space<vmem>>, vector<1x16x256xf32>
      %127 = vector.shape_cast %126 : vector<1x16x256xf32> to vector<16x256xf32>
      %128 = vector.shape_cast %125 : vector<16x256xf32> to vector<1x16x256xf32>
      tpu.vector_store %arg5[%c0_34, %c0_35, %c0_36], %128 {strides = array<i32>} : memref<1x16x256xf32, #tpu.memory_space<vmem>>, vector<1x16x256xf32>,
    } else {
    }
    %c1_i32_6 = arith.constant 1 : i32
    %8 = arith.cmpi sge, %arg1, %c1_i32_6 : i32
    %9 = arith.extui %8 : i1 to i32
    %c0_i32_7 = arith.constant 0 : i32
    %10 = arith.cmpi ne, %9, %c0_i32_7 : i32
    scf.if %10 {
      %c15_i32 = arith.constant 15 : i32
      %11 = vector.broadcast %c15_i32 : i32 to vector<1x256xi32>
      %12 = arith.andi %4, %11 : vector<1x256xi32>
      %c-3_i32 = arith.constant -3 : i32
      %13 = vector.broadcast %c-3_i32 : i32 to vector<1x256xi32>
      %14 = arith.addi %12, %13 : vector<1x256xi32>
      %c0_i32_8 = arith.constant 0 : i32
      %15 = vector.broadcast %c0_i32_8 : i32 to vector<1x256xi32>
      %16 = arith.cmpi sge, %14, %15 : vector<1x256xi32>
      %c-3_i32_9 = arith.constant -3 : i32
      %17 = vector.broadcast %c-3_i32_9 : i32 to vector<1x256xi32>
      %18 = arith.addi %12, %17 : vector<1x256xi32>
      %c16_i32 = arith.constant 16 : i32
      %19 = vector.broadcast %c16_i32 : i32 to vector<1x256xi32>
      %20 = arith.cmpi slt, %18, %19 : vector<1x256xi32>
      %21 = arith.andi %16, %20 : vector<1x256xi1>
      %c-2_i32 = arith.constant -2 : i32
      %22 = vector.broadcast %c-2_i32 : i32 to vector<1x256xi32>
      %23 = arith.addi %12, %22 : vector<1x256xi32>
      %c0_i32_10 = arith.constant 0 : i32
      %24 = vector.broadcast %c0_i32_10 : i32 to vector<1x256xi32>
      %25 = arith.cmpi sge, %23, %24 : vector<1x256xi32>
      %c-2_i32_11 = arith.constant -2 : i32
      %26 = vector.broadcast %c-2_i32_11 : i32 to vector<1x256xi32>
      %27 = arith.addi %12, %26 : vector<1x256xi32>
      %c16_i32_12 = arith.constant 16 : i32
      %28 = vector.broadcast %c16_i32_12 : i32 to vector<1x256xi32>
      %29 = arith.cmpi slt, %27, %28 : vector<1x256xi32>
      %30 = arith.andi %25, %29 : vector<1x256xi1>
      %c-1_i32 = arith.constant -1 : i32
      %31 = vector.broadcast %c-1_i32 : i32 to vector<1x256xi32>
      %32 = arith.addi %12, %31 : vector<1x256xi32>
      %c0_i32_13 = arith.constant 0 : i32
      %33 = vector.broadcast %c0_i32_13 : i32 to vector<1x256xi32>
      %34 = arith.cmpi sge, %32, %33 : vector<1x256xi32>
      %c-1_i32_14 = arith.constant -1 : i32
      %35 = vector.broadcast %c-1_i32_14 : i32 to vector<1x256xi32>
      %36 = arith.addi %12, %35 : vector<1x256xi32>
      %c16_i32_15 = arith.constant 16 : i32
      %37 = vector.broadcast %c16_i32_15 : i32 to vector<1x256xi32>
      %38 = arith.cmpi slt, %36, %37 : vector<1x256xi32>
      %39 = arith.andi %34, %38 : vector<1x256xi1>
      %c1_i32_16 = arith.constant 1 : i32
      %40 = vector.broadcast %c1_i32_16 : i32 to vector<1x256xi32>
      %41 = arith.addi %12, %40 : vector<1x256xi32>
      %c0_i32_17 = arith.constant 0 : i32
      %42 = vector.broadcast %c0_i32_17 : i32 to vector<1x256xi32>
      %43 = arith.cmpi sge, %41, %42 : vector<1x256xi32>
      %c1_i32_18 = arith.constant 1 : i32
      %44 = vector.broadcast %c1_i32_18 : i32 to vector<1x256xi32>
      %45 = arith.addi %12, %44 : vector<1x256xi32>
      %c16_i32_19 = arith.constant 16 : i32
      %46 = vector.broadcast %c16_i32_19 : i32 to vector<1x256xi32>
      %47 = arith.cmpi slt, %45, %46 : vector<1x256xi32>
      %48 = arith.andi %43, %47 : vector<1x256xi1>
      %c2_i32 = arith.constant 2 : i32
      %49 = vector.broadcast %c2_i32 : i32 to vector<1x256xi32>
      %50 = arith.addi %12, %49 : vector<1x256xi32>
      %c0_i32_20 = arith.constant 0 : i32
      %51 = vector.broadcast %c0_i32_20 : i32 to vector<1x256xi32>
      %52 = arith.cmpi sge, %50, %51 : vector<1x256xi32>
      %c2_i32_21 = arith.constant 2 : i32
      %53 = vector.broadcast %c2_i32_21 : i32 to vector<1x256xi32>
      %54 = arith.addi %12, %53 : vector<1x256xi32>
      %c16_i32_22 = arith.constant 16 : i32
      %55 = vector.broadcast %c16_i32_22 : i32 to vector<1x256xi32>
      %56 = arith.cmpi slt, %54, %55 : vector<1x256xi32>
      %57 = arith.andi %52, %56 : vector<1x256xi1>
      %c3_i32 = arith.constant 3 : i32
      %58 = vector.broadcast %c3_i32 : i32 to vector<1x256xi32>
      %59 = arith.addi %12, %58 : vector<1x256xi32>
      %c0_i32_23 = arith.constant 0 : i32
      %60 = vector.broadcast %c0_i32_23 : i32 to vector<1x256xi32>
      %61 = arith.cmpi sge, %59, %60 : vector<1x256xi32>
      %c3_i32_24 = arith.constant 3 : i32
      %62 = vector.broadcast %c3_i32_24 : i32 to vector<1x256xi32>
      %63 = arith.addi %12, %62 : vector<1x256xi32>
      %c16_i32_25 = arith.constant 16 : i32
      %64 = vector.broadcast %c16_i32_25 : i32 to vector<1x256xi32>
      %65 = arith.cmpi slt, %63, %64 : vector<1x256xi32>
      %66 = arith.andi %61, %65 : vector<1x256xi1>
      %cst = arith.constant 0.000000e+00 : f32
      %67 = vector.broadcast %cst : f32 to vector<16x256xf32>
      %c3_i32_26 = arith.constant 3 : i32
      %68 = tpu.dynamic_rotate %1 by %c3_i32_26 dim 1 : vector<16x256xf32>, i32 -> vector<16x256xf32>
      %cst_27 = arith.constant 0.000000e+00 : f32
      %69 = vector.shape_cast %21 : vector<1x256xi1> to vector<1x256xi1>
      %70 = vector.broadcast %69 : vector<1x256xi1> to vector<16x256xi1>
      %71 = vector.broadcast %cst_27 : f32 to vector<16x256xf32>
      %72 = arith.select %70, %68, %71 : vector<16x256xi1>, vector<16x256xf32>
      %73 = vector.extract_strided_slice %2 {offsets = [0, 0], sizes = [16, 1], strides = [1, 1]} : vector<16x7xf32> to vector<16x1xf32>
      %74 = vector.broadcast %73 : vector<16x1xf32> to vector<16x256xf32>
      %75 = arith.mulf %72, %74 : vector<16x256xf32>
      %76 = arith.addf %67, %75 : vector<16x256xf32>
      %c2_i32_28 = arith.constant 2 : i32
      %77 = tpu.dynamic_rotate %1 by %c2_i32_28 dim 1 : vector<16x256xf32>, i32 -> vector<16x256xf32>
      %cst_29 = arith.constant 0.000000e+00 : f32
      %78 = vector.shape_cast %30 : vector<1x256xi1> to vector<1x256xi1>
      %79 = vector.broadcast %78 : vector<1x256xi1> to vector<16x256xi1>
      %80 = vector.broadcast %cst_29 : f32 to vector<16x256xf32>
      %81 = arith.select %79, %77, %80 : vector<16x256xi1>, vector<16x256xf32>
      %82 = vector.extract_strided_slice %2 {offsets = [0, 1], sizes = [16, 1], strides = [1, 1]} : vector<16x7xf32> to vector<16x1xf32>
      %83 = vector.broadcast %82 : vector<16x1xf32> to vector<16x256xf32>
      %84 = arith.mulf %81, %83 : vector<16x256xf32>
      %85 = arith.addf %76, %84 : vector<16x256xf32>
      %c1_i32_30 = arith.constant 1 : i32
      %86 = tpu.dynamic_rotate %1 by %c1_i32_30 dim 1 : vector<16x256xf32>, i32 -> vector<16x256xf32>
      %cst_31 = arith.constant 0.000000e+00 : f32
      %87 = vector.shape_cast %39 : vector<1x256xi1> to vector<1x256xi1>
      %88 = vector.broadcast %87 : vector<1x256xi1> to vector<16x256xi1>
      %89 = vector.broadcast %cst_31 : f32 to vector<16x256xf32>
      %90 = arith.select %88, %86, %89 : vector<16x256xi1>, vector<16x256xf32>
      %91 = vector.extract_strided_slice %2 {offsets = [0, 2], sizes = [16, 1], strides = [1, 1]} : vector<16x7xf32> to vector<16x1xf32>
      %92 = vector.broadcast %91 : vector<16x1xf32> to vector<16x256xf32>
      %93 = arith.mulf %90, %92 : vector<16x256xf32>
      %94 = arith.addf %85, %93 : vector<16x256xf32>
      %95 = vector.extract_strided_slice %2 {offsets = [0, 3], sizes = [16, 1], strides = [1, 1]} : vector<16x7xf32> to vector<16x1xf32>
      %96 = vector.broadcast %95 : vector<16x1xf32> to vector<16x256xf32>
      %97 = arith.mulf %1, %96 : vector<16x256xf32>
      %98 = arith.addf %94, %97 : vector<16x256xf32>
      %c255_i32 = arith.constant 255 : i32
      %99 = tpu.dynamic_rotate %1 by %c255_i32 dim 1 : vector<16x256xf32>, i32 -> vector<16x256xf32>
      %cst_32 = arith.constant 0.000000e+00 : f32
      %100 = vector.shape_cast %48 : vector<1x256xi1> to vector<1x256xi1>
      %101 = vector.broadcast %100 : vector<1x256xi1> to vector<16x256xi1>
      %102 = vector.broadcast %cst_32 : f32 to vector<16x256xf32>
      %103 = arith.select %101, %99, %102 : vector<16x256xi1>, vector<16x256xf32>
      %104 = vector.extract_strided_slice %2 {offsets = [0, 4], sizes = [16, 1], strides = [1, 1]} : vector<16x7xf32> to vector<16x1xf32>
      %105 = vector.broadcast %104 : vector<16x1xf32> to vector<16x256xf32>
      %106 = arith.mulf %103, %105 : vector<16x256xf32>
      %107 = arith.addf %98, %106 : vector<16x256xf32>
      %c254_i32 = arith.constant 254 : i32
      %108 = tpu.dynamic_rotate %1 by %c254_i32 dim 1 : vector<16x256xf32>, i32 -> vector<16x256xf32>
      %cst_33 = arith.constant 0.000000e+00 : f32
      %109 = vector.shape_cast %57 : vector<1x256xi1> to vector<1x256xi1>
      %110 = vector.broadcast %109 : vector<1x256xi1> to vector<16x256xi1>
      %111 = vector.broadcast %cst_33 : f32 to vector<16x256xf32>
      %112 = arith.select %110, %108, %111 : vector<16x256xi1>, vector<16x256xf32>
      %113 = vector.extract_strided_slice %2 {offsets = [0, 5], sizes = [16, 1], strides = [1, 1]} : vector<16x7xf32> to vector<16x1xf32>
      %114 = vector.broadcast %113 : vector<16x1xf32> to vector<16x256xf32>
      %115 = arith.mulf %112, %114 : vector<16x256xf32>
      %116 = arith.addf %107, %115 : vector<16x256xf32>
      %c253_i32 = arith.constant 253 : i32
      %117 = tpu.dynamic_rotate %1 by %c253_i32 dim 1 : vector<16x256xf32>, i32 -> vector<16x256xf32>
      %cst_34 = arith.constant 0.000000e+00 : f32
      %118 = vector.shape_cast %66 : vector<1x256xi1> to vector<1x256xi1>
      %119 = vector.broadcast %118 : vector<1x256xi1> to vector<16x256xi1>
      %120 = vector.broadcast %cst_34 : f32 to vector<16x256xf32>
      %121 = arith.select %119, %117, %120 : vector<16x256xi1>, vector<16x256xf32>
      %122 = vector.extract_strided_slice %2 {offsets = [0, 6], sizes = [16, 1], strides = [1, 1]} : vector<16x7xf32> to vector<16x1xf32>
      %123 = vector.broadcast %122 : vector<16x1xf32> to vector<16x256xf32>
      %124 = arith.mulf %121, %123 : vector<16x256xf32>
      %125 = arith.addf %116, %124 : vector<16x256xf32>
      %126 = vector.broadcast %3 : vector<16x1xf32> to vector<16x256xf32>
      %127 = arith.addf %125, %126 : vector<16x256xf32>
      %c0_35 = arith.constant 0 : index
      %c0_36 = arith.constant 0 : index
      %c0_37 = arith.constant 0 : index
      %128 = vector.load %arg5[%c0_35, %c0_36, %c0_37] : memref<1x16x256xf32, #tpu.memory_space<vmem>>, vector<1x16x256xf32>
      %129 = vector.shape_cast %128 : vector<1x16x256xf32> to vector<16x256xf32>
      %130 = vector.shape_cast %127 : vector<16x256xf32> to vector<1x16x256xf32>
      tpu.vector_store %arg5[%c0_35, %c0_36, %c0_37], %130 {strides = array<i32>} : memref<1x16x256xf32, #tpu.memory_space<vmem>>, vector<1x16x256xf32>,
    } else {
    }
    return
  }
  func.func @transform_0(%arg0: i32, %arg1: i32) -> (i32, i32, i32) {
    %c0_i32 = arith.constant 0 : i32
    %c0_i32_0 = arith.constant 0 : i32
    return %arg0, %arg1, %c0_i32 : i32, i32, i32
  }
  func.func @transform_1(%arg0: i32, %arg1: i32) -> (i32, i32) {
    %c0_i32 = arith.constant 0 : i32
    %c0_i32_0 = arith.constant 0 : i32
    return %arg1, %c0_i32 : i32, i32
  }
  func.func @transform_2(%arg0: i32, %arg1: i32) -> (i32, i32) {
    %c0_i32 = arith.constant 0 : i32
    %c0_i32_0 = arith.constant 0 : i32
    return %arg1, %c0_i32 : i32, i32
  }
  func.func @transform_3(%arg0: i32, %arg1: i32) -> (i32, i32, i32) {
    %c0_i32 = arith.constant 0 : i32
    %c0_i32_0 = arith.constant 0 : i32
    return %arg0, %arg1, %c0_i32 : i32, i32, i32
  }
}

</mosaic_0001>

<bundles_post_ra>
// kernel: tpu_custom_call.1
= control target key start
LH: loop header
LB: loop body
LE: loop exit
PB: predicated region body
PF: predicated region fallthrough
CT: control target
= control target key end

     0   :  { %8 = vsyncpa [#allocation3], 0  ;;  %s2032_s0 = inlined_call_operand.hbm [shape: f32[2,32,256], index: 0, kind: input, shape index: {}]   ;;  %s2033_s1 = inlined_call_operand.vmem [shape: f32[32,7], index: 1, kind: input, shape index: {}]   ;;  %s2034_s2 = inlined_call_operand.vmem [shape: f32[32,1], index: 2, kind: input, shape index: {}]   ;;  %s2035_s3 = inlined_call_operand.hbm [shape: f32[2,32,256], index: 3, kind: output, shape index: {}]  }
   0x1   :  { %10 = vsyncpa [#allocation3 + $0x1], 0 }
   0x2   :  { %11 = vsyncpa [#allocation4], 0 }
   0x3   :  { %13 = vsyncpa [#allocation4 + $0x1], 0  ;;  %s1363_s12 = smov 0   ;;  %s1365_s13 = smov 0  }
   0x4   :  { %s1367_s14 = smov 0   ;;  %s1369_s15 = smov 0  }
   0x5   :  { %s1371_s16 = smov 0   ;;  %s1373_s17 = smov 0  }
   0x6   :  { %s1375_s18 = smov 0   ;;  %s1377_s19 = smov 0  }
   0x7 LB: > { %s1018_s20 = sadd.s32 4294967295, %s1309_s19   ;;  %s1019_s21 = sadd.s32 4294967294, %s1309_s19   ;;  %s1309_s19 = sphi %s1377_s19, %s19_s19   ;;  %s1305_s18 = sphi %s1375_s18, %s2053_s18   ;;  %s1301_s17 = sphi %s1373_s17, %s2052_s17   ;;  %s1297_s16 = sphi %s1371_s16, %s2051_s16   ;;  %s1293_s15 = sphi %s1369_s15, %s2050_s15   ;;  %s1289_s14 = sphi %s1367_s14, %s2049_s14   ;;  %s1285_s13 = sphi %s1365_s13, %s2048_s13   ;;  %s1281_s12 = sphi %s1363_s12, %s2047_s12  }
   0x8   : > { %s28_s22 = sadd.s32 1, %s1301_s17  ;;  %s31_s23 = sadd.s32 1, %s1305_s18 }
   0x9   : > { %p29_p0 = scmp.ge.s32.totalorder %s28_s22, 2  ;;  %s40_s24 = sadd.s32 1, %s1289_s14 }
   0xa   : > { %p47_p1 = scmp.ne.s32.totalorder %s1289_s14, %s1285_s13  ;;  %p48_p2 = scmp.eq.s32.totalorder %s1309_s19, 0 }
   0xb   : > { %s2055_s22 = smov (%p29_p0, %s28_s22), 0  ;;  %s2057_s23 = smov (!%p29_p0, %s31_s23), %s1305_s18 }
   0xc   : > { %s36_s25 = ssub.s32 %s1301_s17, %s2055_s22  ;;  %p1416_p3 = por %p48_p2, %p47_p1 }
   0xd   : > { %p33_p4 = scmp.ge.s32.totalorder %s2057_s23, 2  ;;  %p53_p5 = scmp.ne.s32.totalorder %s1285_s13, %s1281_s12 }
   0xe   : > { %p54_p6 = scmp.eq.s32.totalorder %s1018_s20, 0  ;;  %p131_p7 = scmp.eq.s32.totalorder %s1018_s20, 3 }
   0xf   : > { %s2059_s23 = smov (%p33_p4, %s2057_s23), 0  ;;  %p137_p10 = scmp.eq.s32.totalorder %s1019_s21, 3 }
  0x10   : > { %2039 = sst [smem:[#allocation8_spill]] %s2059_s23  ;;  %p1424_p8 = por %p54_p6, %p53_p5 }
  0x11   : > { %p1428_p9 = por %p131_p7, %p47_p1  ;;  %s35_s29 = ssub.s32 %s1305_s18, %s2059_s23 }
  0x12   : > { %s37_s30 = sor.u32 %s36_s25, %s35_s29  ;;  %p1434_p12 = por %p137_p10, %p53_p5 }
  0x13   : > { %s2041_s28 = scalar_select %p1428_p9, 1, 0 }
  0x14   : > { %p38_p11 = scmp.eq.s32.totalorder %s37_s30, 0  ;;  %p1057_p13 = scmp.lt.s32.totalorder %s1309_s19, 4 }
  0x15   : > { %s2042_s4 = scalar_select %p1434_p12, 1, 0 }
  0x16   : > { %s157_s5 = sand.u32 1, %s1289_s14   ;;  %s1043_s8 = sshll.u32 %s1301_s17, 2 }
  0x17   : > { %s1441_s6 = scalar_select %p38_p11, %s1289_s14, %s40_s24  }
  0x18   : > { %s1022_s7 = sshll.u32 %s157_s5, 5  ;;  %s1025_s9 = sshll.u32 %s1305_s18, 3 }
  0x19   : > { %s161_s10 = scalar_lea.vmem [#allocation2], %s1022_s7  ;;  %s168_s20 = sadd.s32 %s1043_s8, %s1025_s9 }
  0x1a   : > { %s171_s11 = sshll.u32 %s161_s10, 4  ;;  %s1026_s23 = sshll.u32 %s168_s20, 7  ;;  %s1445_s11 = int_to_ptr.vmem [resolvable:$true] %s171_s11 }
  0x1b   : > { %p1449_p0 = pnand %p1057_p13, %p1416_p3  ;;  %s1456_s24 = scalar_lea.hbm %s2032_s0, %s1026_s23 }
  0x1c   : > { %s1458_s30 = scalar_lea.sflag [#allocation3], %s157_s5  ;;  %s1181_s7 = scalar_lea.hbm %s1456_s24, 512 }
  0x1d   : > { %p1182_p1 = scmp.ne.s32.totalorder %s1456_s24, %s1181_s7  ;;  %p1183_p2 = pneg %p1449_p0 }
  0x1e   : > { %s1186_s9 = scalar_lea.hbm %s2032_s0, 2048  ;;  %p1187_p5 = scmp.lt.u32.totalorder %s1456_s24, %s2032_s0 }
  0x1f   : > { %p1184_p3 = pnand %p1183_p2, %p1182_p1  ;;  %p1188_p6 = scmp.lt.u32.totalorder %s1186_s9, %s1181_s7 }
  0x20   : > { %p1190_p10 = scmp.lt.u32.totalorder %s1181_s7, %s1456_s24 }
  0x21   : > { %p1185_p4 = pneg %p1184_p3  ;;  %p1189_p7 = por %p1188_p6, %p1187_p5 }
  0x23   : > { %p1191_p11 = por %p1190_p10, %p1189_p7 }
  0x25   : > { %p1192_p13 = pnand %p1191_p11, %p1185_p4 }
  0x27   : > { %1195 = shalt.err (!%p1192_p13)
}
  0x28   : > { %s1196_s5 = scalar_lea.vmem %s1445_s11, 512  ;;  %s1311_s20 = smov [#allocation2]  }
  0x29   : > { %p1197_p1 = scmp.ne.s32.totalorder %s1445_s11, %s1196_s5  ;;  %s1201_s25 = sshll.u32 %s1311_s20, 4  ;;  %s1202_s25 = int_to_ptr.vmem [resolvable:$false] %s1201_s25 }
  0x2a   : > { %s1203_s29 = scalar_lea.vmem %s1202_s25, 1024  ;;  %p1204_p9 = scmp.lt.s32.totalorder %s1445_s11, %s1202_s25 }
  0x2b   : > { %p1199_p3 = pnand %p1197_p1, %p1183_p2  ;;  %p1205_p5 = scmp.lt.s32.totalorder %s1203_s29, %s1196_s5 }
  0x2d   : > { %p1200_p12 = pneg %p1199_p3  ;;  %p1206_p6 = por %p1205_p5, %p1204_p9 }
  0x2f   : > { %p1207_p7 = pnand %p1206_p6, %p1200_p12 }
  0x31   : > { %1210 = shalt.err (!%p1207_p7)
}
  0x32   : > { %s1312_s7 = smov 256   ;;  %s1313_s26 = smov 16  }
  0x33   : > { %1052 = dma.hbm_to_vmem [thread:$0]  (!%p1449_p0), %s1456_s24, 512, %s1445_s11, %s1458_s30, %s1312_s7, %s1312_s7, %s1313_s26  }
  0x34   : > { %p1027_p2 = scmp.ge.s32.totalorder %s1309_s19, 1  ;;  %p197_p4 = scmp.lt.s32.totalorder %s1309_s19, 5 }
  0x36   : > { %p198_p10 = pnand %p1027_p2, %p197_p4 }
  0x37   : > { %s1489_s8 = sand.u32 (!%p198_p10), 1, %s1285_s13  }
  0x38   : > { %201 = sbr.rel (%p198_p10) target bundleno = 554 (0x22a), region = 32  ;;  %s1028_s9 = sshll.u32 (!%p198_p10), %s1489_s8, 5 }
  0x39   : > { %s204_s23 = scalar_lea.sflag (!%p198_p10), [#allocation3], %s1489_s8  ;;  %s207_s10 = scalar_lea.vmem (!%p198_p10), [#allocation2], %s1028_s9 }
  0x3f   : > { %1272 = dma.done.wait (%p1424_p8), %s204_s23, 512  }
  0x40   : > { %1274 = vsyncadd (%p1424_p8), %s204_s23, 4294966784  ;;  %s1030_s11 = sshll.u32 %s1293_s15, 1  ;;  %v262_v0 = vlaneseq  ;;  %v1509_v3 = vld [vmem:[%s207_s10] sm:$0xff]  ;;  %v1511_v4 = vld [vmem:[%s207_s10 + $0x8] sm:$0xff]  ;;  %s1525_s29 = scalar_lea.vmem [#allocation5], %s1028_s9 }
  0x41   : > { %p242_p9 = scmp.lt.s32.totalorder %s1030_s11, 3  ;;  %v1513_v5 = vld [vmem:[%s207_s10 + $0x10] sm:$0xff]  ;;  %v1515_v6 = vld [vmem:[%s207_s10 + $0x18] sm:$0xff]  ;;  %p1034_p8 = scmp.ge.s32.totalorder %s1293_s15, 1 }
  0x42   : > { %v1498_v1 = vand.u32 127, %v262_v0  ;;  %s1314_s7 = smov (!%p1034_p8), 48   ;;  %v1315_v11 = vmov (!%p1034_p8), 0   ;;  %v1316_v12 = vmov (!%p1034_p8), 1   ;;  %s1317_s26 = smov (!%p1034_p8), 32   ;;  %v1318_v13 = vmov (!%p1034_p8), 2  }
  0x43   : > { %s2061_s11 = smov (!%p242_p9, %s1030_s11), 3  ;;  %268 = sbr.rel (%p1034_p8) target bundleno = 296 (0x128), region = 40 }
  0x44   : > { %v1501_v2 = vadd.s32 128, %v1498_v1  ;;  %s1031_s21 = sshll.u32 %s2061_s11, 3  ;;  %321 = vrot.lane.b32.xlu1 (!%p1034_p8), %v1511_v4, %s1314_s7  ;;  %317 = vrot.lane.b32.xlu0 (!%p1034_p8), %v1509_v3, %s1314_s7  ;;  %s1319_s9 = smov (!%p1034_p8), 16   ;;  %v1320_v14 = vmov (!%p1034_p8), 4   ;;  %v1321_v15 = vmov (!%p1034_p8), 5   ;;  %v1322_v16 = vmov (!%p1034_p8), 3  }
  0x45   : > { %s245_s5 = scalar_lea.vmem %s2033_s1, %s1031_s21  ;;  %s251_s27 = scalar_lea.vmem %s2034_s2, %s1031_s21  ;;  %1153 = vset.pattern.permute.xlu1 (!%p1034_p8), %v1315_v11  ;;  %1155 = vset.pattern.permute.xlu0 (!%p1034_p8), %v1316_v12  ;;  %v1323_v17 = vmov (!%p1034_p8), 6   ;;  %vm325_vm0 = vcmp.lt.s32.totalorder (!%p1034_p8), %v1498_v1, 48  ;;  %v269_v37 = vadd.s32 (!%p1034_p8), 4294967248, %v1498_v1  ;;  %v277_v39 = vadd.s32 (!%p1034_p8), 4294967264, %v1498_v1 }
  0x46   : > { %v1517_v7 = vld [vmem:[%s245_s5] sm:$0xff]  ;;  %v1519_v8 = vld [vmem:[%s245_s5 + $0x8] sm:$0xff]  ;;  %s1324_s23 = smov (!%p1034_p8), 112   ;;  %s1325_s10 = smov (!%p1034_p8), 96   ;;  %vm364_vm1 = vcmp.lt.s32.totalorder (!%p1034_p8), %v1498_v1, 32  ;;  %v285_v62 = vadd.s32 (!%p1034_p8), 4294967280, %v1498_v1 }
  0x47   : > { %v1521_v9 = vld [vmem:[%s251_s27] sm:$0xff]  ;;  %v1523_v10 = vld [vmem:[%s251_s27 + $0x8] sm:$0xff]  ;;  %s1326_s11 = smov (!%p1034_p8), 80   ;;  %vm271_vm2 = vcmp.ge.s32.totalorder (!%p1034_p8), %v269_v37, 0  ;;  %vm279_vm3 = vcmp.ge.s32.totalorder (!%p1034_p8), %v277_v39, 0  ;;  %vm401_vm4 = vcmp.lt.s32.totalorder (!%p1034_p8), %v1498_v1, 16 }
  0x48   : > { %323 = vrot.lane.b32.xlu1 (!%p1034_p8), %v1515_v6, %s1314_s7  ;;  %319 = vrot.lane.b32.xlu0 (!%p1034_p8), %v1513_v5, %s1314_s7  ;;  %vm287_vm5 = vcmp.ge.s32.totalorder (!%p1034_p8), %v285_v62, 0  ;;  %vm454_vm6 = vcmp.lt.s32.totalorder (!%p1034_p8), %v1498_v1, 112  ;;  %v1643_v37 = vadd.s32 (!%p1034_p8), 48, %v1501_v2  ;;  %vm528_vm8 = vcmp.lt.s32.totalorder (!%p1034_p8), %v1498_v1, 80 }
  0x49   : > { %vm491_vm9 = vcmp.lt.s32.totalorder (!%p1034_p8), %v1498_v1, 96 }
  0x4a   : > { %vm314_vm11 = vcmp.lt.s32.totalorder %v1643_v37, 256 }
  0x4c   : > { %345 = vperm.xlu1 %1153, %v1519_v8   ;;  %358 = vrot.lane.b32.xlu0 %v1513_v5, %s1317_s26 }
  0x50   : > { %356 = vrot.lane.b32.xlu1 %v1509_v3, %s1317_s26  ;;  %362 = vrot.lane.b32.xlu0 %v1515_v6, %s1317_s26 }
  0x51   : > { %1154 = vset.pattern.permute.xlu1 %v1316_v12 }
  0x54   : > { %360 = vrot.lane.b32.xlu1 %v1511_v4, %s1317_s26  ;;  %382 = vperm.xlu0 %1155, %v1519_v8  }
  0x58   : > { %378 = vperm.xlu1 %1154, %v1517_v7   ;;  %1157 = vset.pattern.permute.xlu0 %v1318_v13 }
  0x59   : > { %419 = vperm.xlu0 %1157, %v1519_v8  }
  0x5c   : > { %393 = vrot.lane.b32.xlu1 %v1509_v3, %s1319_s9 }
  0x5d   : > { %1159 = vset.pattern.permute.xlu0 %v1320_v14  ;;  %1156 = vset.pattern.permute.xlu1 %v1318_v13 }
  0x5e   : > { %468 = vperm.xlu0 %1159, %v1517_v7  }
  0x60   : > { %415 = vperm.xlu1 %1156, %v1517_v7  }
  0x62   : > { %397 = vrot.lane.b32.xlu0 %v1511_v4, %s1319_s9 }
  0x63   : > { %1161 = vset.pattern.permute.xlu0 %v1321_v15 }
  0x64   : > { %1158 = vset.pattern.permute.xlu1 %v1322_v16 }
  0x65   : > { %431 = vperm.xlu1 %1158, %v1517_v7  }
  0x66   : > { %505 = vperm.xlu0 %1161, %v1517_v7  }
  0x69   : > { %435 = vperm.xlu1 %1158, %v1519_v8  }
  0x6a   : > { %1164 = vset.pattern.permute.xlu0 %v1323_v17 }
  0x6b   : > { %546 = vperm.xlu0 %1164, %v1519_v8  }
  0x6d   : > { %1160 = vset.pattern.permute.xlu1 %v1320_v14 }
  0x6e   : > { %472 = vperm.xlu1 %1160, %v1519_v8  }
  0x6f   : > { %1165 = vset.pattern.permute.xlu0 %v1315_v11 }
  0x70   : > { %340 = vperm.xlu0 %1165, %v1517_v7  }
  0x72   : > { %395 = vrot.lane.b32.xlu1 %v1513_v5, %s1319_s9 }
  0x73   : > { %1162 = vset.pattern.permute.xlu1 %v1321_v15 }
  0x74   : > { %450 = vrot.lane.b32.xlu0 %v1511_v4, %s1324_s23 }
  0x76   : > { %399 = vrot.lane.b32.xlu1 %v1515_v6, %s1319_s9 }
  0x78   : > { %483 = vrot.lane.b32.xlu0 %v1509_v3, %s1325_s10 }
  0x7a   : > { %509 = vperm.xlu1 %1162, %v1519_v8  }
  0x7c   : > { %487 = vrot.lane.b32.xlu0 %v1511_v4, %s1325_s10 }
  0x7e   : > { %1163 = vset.pattern.permute.xlu1 %v1323_v17 }
  0x7f   : > { %542 = vperm.xlu1 %1163, %v1517_v7  }
  0x80   : > { %559 = vperm.xlu0 %1165, %v1521_v9  }
  0x83   : > { %446 = vrot.lane.b32.xlu1 %v1509_v3, %s1324_s23 }
  0x84   : > { %522 = vrot.lane.b32.xlu0 %v1513_v5, %s1326_s11  ;;  %1166 = vset.pattern.permute.xlu1 %v1315_v11 }
  0x87   : > { %448 = vrot.lane.b32.xlu1 %v1513_v5, %s1324_s23 }
  0x88   : > { %526 = vrot.lane.b32.xlu0 %v1515_v6, %s1326_s11 }
  0x8b   : > { %452 = vrot.lane.b32.xlu1 %v1515_v6, %s1324_s23 }
  0x8f   : > { %485 = vrot.lane.b32.xlu1 %v1513_v5, %s1325_s10 }
  0x93   : > { %489 = vrot.lane.b32.xlu1 %v1515_v6, %s1325_s10 }
  0x97   : > { %564 = vperm.xlu1 %1166, %v1523_v10  }
  0x9b   : > { %520 = vrot.lane.b32.xlu1 %v1509_v3, %s1326_s11 }
  0x9f   : > { %524 = vrot.lane.b32.xlu1 %v1511_v4, %s1326_s11 }
  0xb6   : > { %v322_v18 = vpop.permute.xlu1 %321  ;;  %v318_v19 = vpop.permute.xlu0 %317 }
  0xb7   : > { %v326_v20 = vsel %vm325_vm0, %v318_v19, %v322_v18  ;;  %v328_v41 = vsel %vm325_vm0, %v322_v18, %v318_v19 }
  0xb8   : > { %v334_v47 = vsel %vm271_vm2, %v328_v41, 0.0 }
  0xba   : > { %v320_v21 = vpop.permute.xlu0 %319  ;;  %v324_v22 = vpop.permute.xlu1 %323 }
  0xbb   : > { %v329_v14 = vsel %vm325_vm0, %v324_v22, %v320_v21 }
  0xbe   : > { %v359_v23 = vpop.permute.xlu0 %358 }
  0xc2   : > { %v363_v25 = vpop.permute.xlu0 %362 }
  0xc3   : > { %v368_v61 = vsel %vm364_vm1, %v363_v25, %v359_v23  ;;  %v366_v12 = vsel %vm364_vm1, %v359_v23, %v363_v25  ;;  %v336_v23 = vsel %vm271_vm2, %v329_v14, 0.0  ;;  %v294_v25 = vadd.s32 16, %v1501_v2 }
  0xc4   : > { %v375_v13 = vsel %vm279_vm3, %v368_v61, 0.0 }
  0xc5   : > { %vm298_vm7 = vcmp.lt.s32.totalorder %v294_v25, 256 }
  0xcb   : > { %v346_v24 = vpop.permute.xlu1 %345 }
  0xcf   : > { %v357_v26 = vpop.permute.xlu1 %356 }
  0xd3   : > { %v361_v27 = vpop.permute.xlu1 %360  ;;  %v383_v28 = vpop.permute.xlu0 %382 }
  0xd4   : > { %v367_v42 = vsel %vm364_vm1, %v361_v27, %v357_v26  ;;  %v365_v44 = vsel %vm364_vm1, %v357_v26, %v361_v27  ;;  %v387_v18 = vmul.f32 %v383_v28, %v375_v13  ;;  %v388_v19 = vmul.f32 %v383_v28, %v366_v12 }
  0xd5   : > { %v373_v45 = vsel %vm279_vm3, %v367_v42, 0.0  ;;  %v327_v26 = vsel %vm325_vm0, %v320_v21, %v324_v22  ;;  %v350_v27 = vmul.f32 %v346_v24, %v336_v23  ;;  %v302_v22 = vadd.s32 32, %v1501_v2 }
  0xd7   : > { %v379_v29 = vpop.permute.xlu1 %378  ;;  %vm306_vm10 = vcmp.lt.s32.totalorder %v302_v22, 256 }
  0xd8   : > { %v420_v30 = vpop.permute.xlu0 %419  ;;  %v385_v48 = vmul.f32 %v379_v29, %v373_v45  ;;  %v386_v49 = vmul.f32 %v379_v29, %v365_v44  ;;  %v351_v29 = vmul.f32 %v346_v24, %v327_v26  ;;  %v391_v45 = vadd.f32 %v387_v18, %v350_v27 }
  0xda   : > { %v392_v28 = vadd.f32 %v388_v19, %v351_v29 }
  0xdb   : > { %v1571_v31 = vpop.permute.xlu1 %393 }
  0xdd   : > { %v1573_v32 = vpop.permute.xlu0 %468 }
  0xdf   : > { %v1575_v33 = vpop.permute.xlu1 %415 }
  0xe1   : > { %v1577_v34 = vpop.permute.xlu0 %397 }
  0xe2   : > { %v404_v21 = vsel %vm401_vm4, %v1577_v34, %v1571_v31  ;;  %v402_v62 = vsel %vm401_vm4, %v1571_v31, %v1577_v34 }
  0xe3   : > { %v423_v26 = vmul.f32 %v1575_v33, %v402_v62 }
  0xe4   : > { %v1579_v35 = vpop.permute.xlu1 %431 }
  0xe5   : > { %v1581_v36 = vpop.permute.xlu0 %505 }
  0xe8   : > { %v1584_v38 = vpop.permute.xlu1 %435 }
  0xea   : > { %v1587_v40 = vpop.permute.xlu0 %546 }
  0xed   : > { %v1594_v43 = vpop.permute.xlu1 %472 }
  0xef   : > { %v341_v46 = vpop.permute.xlu0 %340 }
  0xf0   : > { %v348_v50 = vmul.f32 %v341_v46, %v334_v47  ;;  %v349_v51 = vmul.f32 %v341_v46, %v326_v20 }
  0xf1   : > { %v396_v52 = vpop.permute.xlu1 %395 }
  0xf2   : > { %v1600_v53 = vadd.f32 %v385_v48, %v348_v50  ;;  %v1602_v54 = vadd.f32 %v386_v49, %v349_v51  ;;  %v410_v50 = vsel %vm287_vm5, %v404_v21, 0.0  ;;  %v440_v51 = vmul.f32 %v1584_v38, %v1513_v5 }
  0xf3   : > { %v1604_v55 = vpop.permute.xlu0 %450  ;;  %v422_v12 = vmul.f32 %v1575_v33, %v410_v50 }
  0xf5   : > { %v400_v56 = vpop.permute.xlu1 %399  ;;  %v426_v29 = vadd.f32 %v422_v12, %v1600_v53  ;;  %v439_v53 = vmul.f32 %v1579_v35, %v1511_v4 }
  0xf6   : > { %v405_v11 = vsel %vm401_vm4, %v400_v56, %v396_v52  ;;  %v403_v16 = vsel %vm401_vm4, %v396_v52, %v400_v56  ;;  %v441_v52 = vmul.f32 %v1584_v38, %v1515_v6 }
  0xf7   : > { %v1606_v57 = vpop.permute.xlu0 %483  ;;  %v412_v17 = vsel %vm287_vm5, %v405_v11, 0.0  ;;  %v425_v41 = vmul.f32 %v420_v30, %v403_v16 }
  0xf8   : > { %v424_v39 = vmul.f32 %v420_v30, %v412_v17 }
  0xf9   : > { %v1608_v58 = vpop.permute.xlu1 %509  ;;  %v429_v46 = vadd.f32 %v425_v41, %v392_v28 }
  0xfa   : > { %v428_v30 = vadd.f32 %v424_v39, %v391_v45  ;;  %v427_v45 = vadd.f32 %v423_v26, %v1602_v54 }
  0xfb   : > { %v1610_v59 = vpop.permute.xlu0 %487  ;;  %v445_v38 = vadd.f32 %v441_v52, %v429_v46 }
  0xfc   : > { %v444_v13 = vadd.f32 %v440_v51, %v428_v30  ;;  %v494_v25 = vsel %vm491_vm9, %v1610_v59, %v1606_v57  ;;  %v492_v46 = vsel %vm491_vm9, %v1606_v57, %v1610_v59 }
  0xfe   : > { %v1612_v60 = vpop.permute.xlu1 %542 }
  0xff   : > { %v1617_v63 = vpop.permute.xlu0 %559 }
 0x102   : > { %v447_v0 = vpop.permute.xlu1 %446 }
 0x103   : > { %v523_v20 = vpop.permute.xlu0 %522 }
 0x106   : > { %v449_v15 = vpop.permute.xlu1 %448 }
 0x107   : > { %v527_v47 = vpop.permute.xlu0 %526 }
 0x108   : > { %v532_v61 = vsel %vm528_vm8, %v527_v47, %v523_v20  ;;  %v530_v16 = vsel %vm528_vm8, %v523_v20, %v527_v47  ;;  %v455_v20 = vsel %vm454_vm6, %v447_v0, %v1604_v55  ;;  %v443_v47 = vadd.f32 %v439_v53, %v427_v45 }
 0x109   : > { %v540_v31 = vsel %vm314_vm11, %v532_v61, 0.0  ;;  %v551_v41 = vmul.f32 %v1587_v40, %v530_v16 }
 0x10a   : > { %v453_v42 = vpop.permute.xlu1 %452  ;;  %v552_v28 = vmul.f32 %v1587_v40, %v540_v31 }
 0x10b   : > { %v458_v44 = vsel %vm454_vm6, %v453_v42, %v449_v15  ;;  %v456_v24 = vsel %vm454_vm6, %v449_v15, %v453_v42  ;;  %v457_v15 = vsel %vm454_vm6, %v1604_v55, %v447_v0  ;;  %v438_v55 = vmul.f32 %v1579_v35, %v1509_v3 }
 0x10c   : > { %v466_v48 = vsel %vm298_vm7, %v458_v44, 0.0  ;;  %v477_v56 = vmul.f32 %v1594_v43, %v456_v24  ;;  %v464_v39 = vsel %vm298_vm7, %v457_v15, 0.0  ;;  %v475_v0 = vmul.f32 %v1573_v32, %v455_v20 }
 0x10d   : > { %v478_v11 = vmul.f32 %v1594_v43, %v466_v48  ;;  %v476_v54 = vmul.f32 %v1573_v32, %v464_v39  ;;  %v442_v21 = vadd.f32 %v438_v55, %v426_v29  ;;  %v501_v35 = vsel %vm306_vm10, %v494_v25, 0.0 }
 0x10e   : > { %v486_v49 = vpop.permute.xlu1 %485  ;;  %v481_v34 = vadd.f32 %v477_v56, %v444_v13  ;;  %v512_v32 = vmul.f32 %v1581_v36, %v492_v46  ;;  %v513_v52 = vmul.f32 %v1581_v36, %v501_v35 }
 0x10f   : > { %v482_v23 = vadd.f32 %v478_v11, %v445_v38  ;;  %v480_v50 = vadd.f32 %v476_v54, %v443_v47 }
 0x111   : > { %v517_v11 = vadd.f32 %v513_v52, %v480_v50 }
 0x112   : > { %v490_v14 = vpop.permute.xlu1 %489 }
 0x113   : > { %v493_v43 = vsel %vm491_vm9, %v486_v49, %v490_v14  ;;  %v495_v17 = vsel %vm491_vm9, %v490_v14, %v486_v49  ;;  %v479_v49 = vadd.f32 %v475_v0, %v442_v21 }
 0x114   : > { %v503_v18 = vsel %vm306_vm10, %v495_v17, 0.0  ;;  %v514_v19 = vmul.f32 %v1608_v58, %v493_v43 }
 0x115   : > { %v515_v27 = vmul.f32 %v1608_v58, %v503_v18  ;;  %v516_v59 = vadd.f32 %v512_v32, %v479_v49 }
 0x116   : > { %v518_v42 = vadd.f32 %v514_v19, %v481_v34  ;;  %v565_v44 = vpop.permute.xlu1 %564 }
 0x117   : > { %v519_v33 = vadd.f32 %v515_v27, %v482_v23 }
 0x118   : > { %v555_v58 = vadd.f32 %v551_v41, %v518_v42 }
 0x119   : > { %v556_v40 = vadd.f32 %v552_v28, %v519_v33 }
 0x11a   : > { %v569_v24 = vadd.f32 %v565_v44, %v555_v58  ;;  %v521_v30 = vpop.permute.xlu1 %520 }
 0x11b   : > { %v570_v48 = vadd.f32 %v565_v44, %v556_v40 }
 0x11c   : > { %573 = vst [vmem:[%s1525_s29 + $0x10] sm:$0xff] %v569_v24 }
 0x11d   : > { %574 = vst [vmem:[%s1525_s29 + $0x18] sm:$0xff] %v570_v48 }
 0x11e   : > { %v525_v51 = vpop.permute.xlu1 %524 }
 0x11f   : > { %v529_v56 = vsel %vm528_vm8, %v521_v30, %v525_v51  ;;  %v531_v57 = vsel %vm528_vm8, %v525_v51, %v521_v30 }
 0x120   : > { %v538_v22 = vsel %vm314_vm11, %v531_v57, 0.0  ;;  %v549_v61 = vmul.f32 %v1612_v60, %v529_v56 }
 0x121   : > { %v550_v62 = vmul.f32 %v1612_v60, %v538_v22 }
 0x122   : > { %v553_v12 = vadd.f32 %v549_v61, %v516_v59 }
 0x123   : > { %v554_v38 = vadd.f32 %v550_v62, %v517_v11 }
 0x124   : > { %v567_v13 = vadd.f32 %v1617_v63, %v553_v12 }
 0x125   : > { %v568_v36 = vadd.f32 %v1617_v63, %v554_v38 }
 0x126   : > { %571 = vst [vmem:[%s1525_s29] sm:$0xff] %v567_v13 }
 0x127   : > { %572 = vst [vmem:[%s1525_s29 + $0x8] sm:$0xff] %v568_v36 }
 0x128 PF: > { %p1035_p12 = scmp.lt.s32.totalorder %s1293_s15, 1 }
 0x129   : > { %s1327_s21 = smov (!%p1035_p12), 3   ;;  %v1328_v37 = vmov (!%p1035_p12), 0   ;;  %v1329_v60 = vmov (!%p1035_p12), 1   ;;  %s1330_s24 = smov (!%p1035_p12), 2   ;;  %v1331_v63 = vmov (!%p1035_p12), 2   ;;  %v1333_v14 = vmov (!%p1035_p12), 4  }
 0x12a   : > { %578 = sbr.rel (%p1035_p12) target bundleno = 526 (0x20e), region = 44  ;;  %633 = vrot.lane.b32.xlu1 (!%p1035_p12), %v1511_v4, %s1327_s21  ;;  %629 = vrot.lane.b32.xlu0 (!%p1035_p12), %v1509_v3, %s1327_s21  ;;  %s1332_s30 = smov (!%p1035_p12), 1   ;;  %v1334_v15 = vmov (!%p1035_p12), 5   ;;  %v1335_v16 = vmov (!%p1035_p12), 3   ;;  %v1336_v43 = vmov (!%p1035_p12), 6   ;;  %vm637_vm12 = vcmp.lt.s32.totalorder (!%p1035_p12), %v1498_v1, 3 }
 0x12b   : > { %1167 = vset.pattern.permute.xlu1 (!%p1035_p12), %v1328_v37  ;;  %1169 = vset.pattern.permute.xlu0 (!%p1035_p12), %v1329_v60  ;;  %s1337_s5 = smov (!%p1035_p12), 127   ;;  %s1338_s20 = smov (!%p1035_p12), 126   ;;  %v1782_v45 = vand.u32 (!%p1035_p12), 15, %v1498_v1  ;;  %v1785_v28 = vand.u32 (!%p1035_p12), 15, %v1501_v2  ;;  %vm676_vm13 = vcmp.lt.s32.totalorder (!%p1035_p12), %v1498_v1, 2  ;;  %vm713_vm2 = vcmp.lt.s32.totalorder (!%p1035_p12), %v1498_v1, 1 }
 0x12c   : > { %s1339_s25 = smov (!%p1035_p12), 125   ;;  %vm766_vm5 = vcmp.lt.s32.totalorder (!%p1035_p12), %v1498_v1, 127  ;;  %vm803_vm6 = vcmp.lt.s32.totalorder (!%p1035_p12), %v1498_v1, 126  ;;  %vm840_vm9 = vcmp.lt.s32.totalorder (!%p1035_p12), %v1498_v1, 125 }
 0x12d   : > { %v581_v0 = vadd.s32 (!%p1035_p12), 4294967293, %v1782_v45  ;;  %v582_v58 = vadd.s32 (!%p1035_p12), 4294967293, %v1785_v28  ;;  %v589_v25 = vadd.s32 (!%p1035_p12), 4294967294, %v1782_v45  ;;  %v590_v54 = vadd.s32 (!%p1035_p12), 4294967294, %v1785_v28 }
 0x12e   : > { %635 = vrot.lane.b32.xlu1 (!%p1035_p12), %v1515_v6, %s1327_s21  ;;  %631 = vrot.lane.b32.xlu0 (!%p1035_p12), %v1513_v5, %s1327_s21  ;;  %v597_v36 = vadd.s32 (!%p1035_p12), 4294967295, %v1782_v45 }
 0x12f   : > { %vm583_vm14 = vcmp.ge.s32.totalorder (!%p1035_p12), %v581_v0, 0  ;;  %vm584_vm15 = vcmp.ge.s32.totalorder (!%p1035_p12), %v582_v58, 0  ;;  %vm591_vm0 = vcmp.ge.s32.totalorder (!%p1035_p12), %v589_v25, 0  ;;  %vm592_vm1 = vcmp.ge.s32.totalorder (!%p1035_p12), %v590_v54, 0 }
 0x130   : > { %vm599_vm3 = vcmp.ge.s32.totalorder (!%p1035_p12), %v597_v36, 0  ;;  %v605_v54 = vadd.s32 (!%p1035_p12), 1, %v1782_v45  ;;  %v1870_v0 = vadd.s32 (!%p1035_p12), 3, %v1785_v28 }
 0x132   : > { %657 = vperm.xlu1 %1167, %v1519_v8   ;;  %670 = vrot.lane.b32.xlu0 %v1513_v5, %s1330_s24  ;;  %vm609_vm7 = vcmp.lt.s32.totalorder %v605_v54, 16 }
 0x136   : > { %668 = vrot.lane.b32.xlu1 %v1509_v3, %s1330_s24  ;;  %674 = vrot.lane.b32.xlu0 %v1515_v6, %s1330_s24 }
 0x137   : > { %1168 = vset.pattern.permute.xlu1 %v1329_v60 }
 0x13a   : > { %672 = vrot.lane.b32.xlu1 %v1511_v4, %s1330_s24  ;;  %694 = vperm.xlu0 %1169, %v1519_v8  }
 0x13e   : > { %690 = vperm.xlu1 %1168, %v1517_v7   ;;  %1171 = vset.pattern.permute.xlu0 %v1331_v63 }
 0x13f   : > { %731 = vperm.xlu0 %1171, %v1519_v8  }
 0x142   : > { %705 = vrot.lane.b32.xlu1 %v1509_v3, %s1332_s30 }
 0x143   : > { %1173 = vset.pattern.permute.xlu0 %v1333_v14  ;;  %1170 = vset.pattern.permute.xlu1 %v1331_v63 }
 0x144   : > { %780 = vperm.xlu0 %1173, %v1517_v7  }
 0x146   : > { %727 = vperm.xlu1 %1170, %v1517_v7  }
 0x148   : > { %709 = vrot.lane.b32.xlu0 %v1511_v4, %s1332_s30 }
 0x149   : > { %1175 = vset.pattern.permute.xlu0 %v1334_v15 }
 0x14a   : > { %1172 = vset.pattern.permute.xlu1 %v1335_v16 }
 0x14b   : > { %743 = vperm.xlu1 %1172, %v1517_v7  }
 0x14c   : > { %817 = vperm.xlu0 %1175, %v1517_v7  }
 0x14f   : > { %747 = vperm.xlu1 %1172, %v1519_v8  }
 0x150   : > { %1178 = vset.pattern.permute.xlu0 %v1336_v43 }
 0x151   : > { %858 = vperm.xlu0 %1178, %v1519_v8  }
 0x153   : > { %1174 = vset.pattern.permute.xlu1 %v1333_v14 }
 0x154   : > { %784 = vperm.xlu1 %1174, %v1519_v8  }
 0x155   : > { %1179 = vset.pattern.permute.xlu0 %v1328_v37 }
 0x156   : > { %652 = vperm.xlu0 %1179, %v1517_v7  }
 0x158   : > { %707 = vrot.lane.b32.xlu1 %v1513_v5, %s1332_s30 }
 0x159   : > { %1176 = vset.pattern.permute.xlu1 %v1334_v15 }
 0x15a   : > { %762 = vrot.lane.b32.xlu0 %v1511_v4, %s1337_s5 }
 0x15c   : > { %711 = vrot.lane.b32.xlu1 %v1515_v6, %s1332_s30 }
 0x15e   : > { %795 = vrot.lane.b32.xlu0 %v1509_v3, %s1338_s20 }
 0x160   : > { %821 = vperm.xlu1 %1176, %v1519_v8  }
 0x162   : > { %799 = vrot.lane.b32.xlu0 %v1511_v4, %s1338_s20 }
 0x164   : > { %1177 = vset.pattern.permute.xlu1 %v1336_v43 }
 0x165   : > { %854 = vperm.xlu1 %1177, %v1517_v7  }
 0x166   : > { %871 = vperm.xlu0 %1179, %v1521_v9  }
 0x169   : > { %758 = vrot.lane.b32.xlu1 %v1509_v3, %s1337_s5 }
 0x16a   : > { %834 = vrot.lane.b32.xlu0 %v1513_v5, %s1339_s25  ;;  %1180 = vset.pattern.permute.xlu1 %v1328_v37  ;;  %v598_v37 = vadd.s32 4294967295, %v1785_v28 }
 0x16c   : > { %vm600_vm4 = vcmp.ge.s32.totalorder %v598_v37, 0 }
 0x16d   : > { %760 = vrot.lane.b32.xlu1 %v1513_v5, %s1337_s5 }
 0x16e   : > { %838 = vrot.lane.b32.xlu0 %v1515_v6, %s1339_s25 }
 0x171   : > { %764 = vrot.lane.b32.xlu1 %v1515_v6, %s1337_s5 }
 0x175   : > { %797 = vrot.lane.b32.xlu1 %v1513_v5, %s1338_s20 }
 0x179   : > { %801 = vrot.lane.b32.xlu1 %v1515_v6, %s1338_s20 }
 0x17d   : > { %876 = vperm.xlu1 %1180, %v1523_v10  }
 0x181   : > { %832 = vrot.lane.b32.xlu1 %v1509_v3, %s1339_s25 }
 0x185   : > { %836 = vrot.lane.b32.xlu1 %v1511_v4, %s1339_s25 }
 0x19c   : > { %v634_v7 = vpop.permute.xlu1 %633  ;;  %v630_v8 = vpop.permute.xlu0 %629 }
 0x19d   : > { %v638_v9 = vsel %vm637_vm12, %v630_v8, %v634_v7  ;;  %v640_v17 = vsel %vm637_vm12, %v634_v7, %v630_v8 }
 0x19e   : > { %v646_v48 = vsel %vm583_vm14, %v640_v17, 0.0  ;;  %v647_v35 = vsel %vm584_vm15, %v638_v9, 0.0 }
 0x1a0   : > { %v1765_v31 = vpop.permute.xlu0 %631  ;;  %v636_v34 = vpop.permute.xlu1 %635 }
 0x1a1   : > { %v639_v7 = vsel %vm637_vm12, %v1765_v31, %v636_v34  ;;  %v641_v8 = vsel %vm637_vm12, %v636_v34, %v1765_v31 }
 0x1a2   : > { %v648_v34 = vsel %vm583_vm14, %v641_v8, 0.0  ;;  %v649_v25 = vsel %vm584_vm15, %v639_v7, 0.0 }
 0x1a4   : > { %v671_v18 = vpop.permute.xlu0 %670 }
 0x1a8   : > { %v675_v10 = vpop.permute.xlu0 %674 }
 0x1a9   : > { %v678_v38 = vsel %vm676_vm13, %v671_v18, %v675_v10  ;;  %v680_v13 = vsel %vm676_vm13, %v675_v10, %v671_v18  ;;  %v1850_v10 = vadd.s32 2, %v1782_v45 }
 0x1aa   : > { %v687_v16 = vsel %vm591_vm0, %v680_v13, 0.0  ;;  %v688_v43 = vsel %vm592_vm1, %v678_v38, 0.0 }
 0x1ab   : > { %vm617_vm10 = vcmp.lt.s32.totalorder %v1850_v10, 16 }
 0x1b1   : > { %v1767_v19 = vpop.permute.xlu1 %657 }
 0x1b5   : > { %v669_v26 = vpop.permute.xlu1 %668 }
 0x1b9   : > { %v673_v20 = vpop.permute.xlu1 %672  ;;  %v1769_v23 = vpop.permute.xlu0 %694 }
 0x1ba   : > { %v677_v2 = vsel %vm676_vm13, %v669_v26, %v673_v20  ;;  %v679_v21 = vsel %vm676_vm13, %v673_v20, %v669_v26  ;;  %v699_v26 = vmul.f32 %v1769_v23, %v687_v16  ;;  %v700_v20 = vmul.f32 %v1769_v23, %v688_v43 }
 0x1bb   : > { %v685_v30 = vsel %vm591_vm0, %v679_v21, 0.0  ;;  %v686_v46 = vsel %vm592_vm1, %v677_v2, 0.0  ;;  %v606_v2 = vadd.s32 1, %v1785_v28  ;;  %v662_v21 = vmul.f32 %v1767_v19, %v648_v34 }
 0x1bc   : > { %vm626_vm13 = vcmp.lt.s32.totalorder %v1870_v0, 16 }
 0x1bd   : > { %v691_v27 = vpop.permute.xlu1 %690  ;;  %vm610_vm8 = vcmp.lt.s32.totalorder %v606_v2, 16 }
 0x1be   : > { %v1771_v29 = vpop.permute.xlu0 %731  ;;  %v697_v49 = vmul.f32 %v691_v27, %v685_v30  ;;  %v698_v50 = vmul.f32 %v691_v27, %v686_v46  ;;  %v1855_v27 = vadd.s32 2, %v1785_v28  ;;  %v663_v30 = vmul.f32 %v1767_v19, %v649_v25 }
 0x1c0   : > { %vm618_vm11 = vcmp.lt.s32.totalorder %v1855_v27, 16 }
 0x1c1   : > { %v1773_v39 = vpop.permute.xlu1 %705 }
 0x1c3   : > { %v1775_v41 = vpop.permute.xlu0 %780 }
 0x1c5   : > { %v1777_v42 = vpop.permute.xlu1 %727 }
 0x1c7   : > { %v1779_v44 = vpop.permute.xlu0 %709 }
 0x1c8   : > { %v714_v19 = vsel %vm713_vm2, %v1773_v39, %v1779_v44 }
 0x1c9   : > { %v723_v13 = vsel %vm600_vm4, %v714_v19, 0.0 }
 0x1ca   : > { %v1787_v33 = vpop.permute.xlu1 %743 }
 0x1cb   : > { %v1789_v55 = vpop.permute.xlu0 %817 }
 0x1ce   : > { %v1793_v53 = vpop.permute.xlu1 %747 }
 0x1d0   : > { %v1797_v40 = vpop.permute.xlu0 %858 }
 0x1d3   : > { %v1804_v24 = vpop.permute.xlu1 %784 }
 0x1d5   : > { %v653_v47 = vpop.permute.xlu0 %652 }
 0x1d6   : > { %v660_v32 = vmul.f32 %v653_v47, %v646_v48  ;;  %v661_v51 = vmul.f32 %v653_v47, %v647_v35  ;;  %v1867_v48 = vadd.s32 3, %v1782_v45 }
 0x1d7   : > { %v708_v52 = vpop.permute.xlu1 %707 }
 0x1d8   : > { %v1810_v56 = vadd.f32 %v697_v49, %v660_v32  ;;  %v1812_v57 = vadd.f32 %v698_v50, %v661_v51  ;;  %v703_v49 = vadd.f32 %v699_v26, %v662_v21  ;;  %v704_v50 = vadd.f32 %v700_v20, %v663_v30 }
 0x1d9   : > { %v1814_v59 = vpop.permute.xlu0 %762  ;;  %vm625_vm12 = vcmp.lt.s32.totalorder %v1867_v48, 16 }
 0x1db   : > { %v712_v22 = vpop.permute.xlu1 %711 }
 0x1dc   : > { %v715_v14 = vsel %vm713_vm2, %v708_v52, %v712_v22  ;;  %v717_v15 = vsel %vm713_vm2, %v712_v22, %v708_v52 }
 0x1dd   : > { %v1816_v61 = vpop.permute.xlu0 %795  ;;  %v724_v17 = vsel %vm599_vm3, %v717_v15, 0.0  ;;  %v725_v18 = vsel %vm600_vm4, %v715_v14, 0.0 }
 0x1de   : > { %v736_v23 = vmul.f32 %v1771_v29, %v724_v17  ;;  %v737_v46 = vmul.f32 %v1771_v29, %v725_v18  ;;  %v716_v29 = vsel %vm713_vm2, %v1779_v44, %v1773_v39  ;;  %v752_v39 = vmul.f32 %v1793_v53, %v1513_v5 }
 0x1df   : > { %v1818_v11 = vpop.permute.xlu1 %821  ;;  %v722_v38 = vsel %vm599_vm3, %v716_v29, 0.0  ;;  %v753_v44 = vmul.f32 %v1793_v53, %v1515_v6  ;;  %v735_v5 = vmul.f32 %v1777_v42, %v723_v13 }
 0x1e0   : > { %v740_v45 = vadd.f32 %v736_v23, %v703_v49  ;;  %v741_v28 = vadd.f32 %v737_v46, %v704_v50  ;;  %v734_v16 = vmul.f32 %v1777_v42, %v722_v38  ;;  %v750_v49 = vmul.f32 %v1787_v33, %v1509_v3 }
 0x1e1   : > { %v1820_v62 = vpop.permute.xlu0 %799  ;;  %v739_v25 = vadd.f32 %v735_v5, %v1812_v57 }
 0x1e2   : > { %v756_v43 = vadd.f32 %v752_v39, %v740_v45  ;;  %v757_v6 = vadd.f32 %v753_v44, %v741_v28  ;;  %v738_v34 = vadd.f32 %v734_v16, %v1810_v56  ;;  %v804_v56 = vsel %vm803_vm6, %v1816_v61, %v1820_v62 }
 0x1e3   : > { %v812_v45 = vsel %vm617_vm10, %v804_v56, 0.0 }
 0x1e4   : > { %v1822_v12 = vpop.permute.xlu1 %854 }
 0x1e5   : > { %v1830_v60 = vpop.permute.xlu0 %871 }
 0x1e8   : > { %v1832_v63 = vpop.permute.xlu1 %758 }
 0x1e9   : > { %v835_v31 = vpop.permute.xlu0 %834  ;;  %v767_v7 = vsel %vm766_vm5, %v1832_v63, %v1814_v59  ;;  %v769_v8 = vsel %vm766_vm5, %v1814_v59, %v1832_v63 }
 0x1ea   : > { %v775_v21 = vsel %vm609_vm7, %v767_v7, 0.0  ;;  %v776_v30 = vsel %vm610_vm8, %v769_v8, 0.0 }
 0x1eb   : > { %v787_v57 = vmul.f32 %v1775_v41, %v775_v21  ;;  %v788_v54 = vmul.f32 %v1775_v41, %v776_v30  ;;  %v824_v41 = vmul.f32 %v1789_v55, %v812_v45 }
 0x1ec   : > { %v761_v9 = vpop.permute.xlu1 %760 }
 0x1ed   : > { %v839_v32 = vpop.permute.xlu0 %838 }
 0x1ee   : > { %v842_v36 = vsel %vm840_vm9, %v835_v31, %v839_v32  ;;  %v844_v37 = vsel %vm840_vm9, %v839_v32, %v835_v31 }
 0x1ef   : > { %v851_v42 = vsel %vm625_vm12, %v842_v36, 0.0  ;;  %v852_v17 = vsel %vm626_vm13, %v844_v37, 0.0 }
 0x1f0   : > { %v765_v47 = vpop.permute.xlu1 %764  ;;  %v863_v46 = vmul.f32 %v1797_v40, %v851_v42 }
 0x1f1   : > { %v768_v58 = vsel %vm766_vm5, %v761_v9, %v765_v47  ;;  %v770_v35 = vsel %vm766_vm5, %v765_v47, %v761_v9  ;;  %v864_v47 = vmul.f32 %v1797_v40, %v852_v17  ;;  %v806_v40 = vsel %vm803_vm6, %v1820_v62, %v1816_v61 }
 0x1f2   : > { %v777_v51 = vsel %vm609_vm7, %v768_v58, 0.0  ;;  %v778_v52 = vsel %vm610_vm8, %v770_v35, 0.0  ;;  %v813_v28 = vsel %vm618_vm11, %v806_v40, 0.0 }
 0x1f3   : > { %v789_v14 = vmul.f32 %v1804_v24, %v777_v51  ;;  %v790_v15 = vmul.f32 %v1804_v24, %v778_v52  ;;  %v825_v62 = vmul.f32 %v1789_v55, %v813_v28 }
 0x1f4   : > { %v798_v22 = vpop.permute.xlu1 %797 }
 0x1f5   : > { %v793_v20 = vadd.f32 %v789_v14, %v756_v43  ;;  %v794_v59 = vadd.f32 %v790_v15, %v757_v6 }
 0x1f8   : > { %v802_v53 = vpop.permute.xlu1 %801 }
 0x1f9   : > { %v805_v24 = vsel %vm803_vm6, %v798_v22, %v802_v53  ;;  %v807_v9 = vsel %vm803_vm6, %v802_v53, %v798_v22 }
 0x1fa   : > { %v814_v18 = vsel %vm617_vm10, %v805_v24, 0.0  ;;  %v815_v26 = vsel %vm618_vm11, %v807_v9, 0.0 }
 0x1fb   : > { %v826_v63 = vmul.f32 %v1818_v11, %v814_v18  ;;  %v827_v31 = vmul.f32 %v1818_v11, %v815_v26  ;;  %v751_v11 = vmul.f32 %v1787_v33, %v1511_v4  ;;  %v754_v4 = vadd.f32 %v750_v49, %v738_v34 }
 0x1fc   : > { %v877_v23 = vpop.permute.xlu1 %876 }
 0x1fd   : > { %v830_v58 = vadd.f32 %v826_v63, %v793_v20  ;;  %v831_v35 = vadd.f32 %v827_v31, %v794_v59  ;;  %v755_v33 = vadd.f32 %v751_v11, %v739_v25  ;;  %v791_v32 = vadd.f32 %v787_v57, %v754_v4 }
 0x1ff   : > { %v867_v3 = vadd.f32 %v863_v46, %v830_v58  ;;  %v868_v2 = vadd.f32 %v864_v47, %v831_v35  ;;  %v792_v51 = vadd.f32 %v788_v54, %v755_v33  ;;  %v828_v38 = vadd.f32 %v824_v41, %v791_v32 }
 0x200   : > { %v833_v50 = vpop.permute.xlu1 %832 }
 0x201   : > { %v881_v19 = vadd.f32 %v877_v23, %v867_v3  ;;  %v882_v29 = vadd.f32 %v877_v23, %v868_v2  ;;  %v829_v13 = vadd.f32 %v825_v62, %v792_v51 }
 0x203   : > { %885 = vst [vmem:[%s1525_s29 + $0x10] sm:$0xff] %v881_v19  ;;  %886 = vst [vmem:[%s1525_s29 + $0x18] sm:$0xff] %v882_v29 }
 0x204   : > { %v837_v61 = vpop.permute.xlu1 %836 }
 0x205   : > { %v841_v52 = vsel %vm840_vm9, %v833_v50, %v837_v61  ;;  %v843_v10 = vsel %vm840_vm9, %v837_v61, %v833_v50 }
 0x206   : > { %v849_v27 = vsel %vm625_vm12, %v841_v52, 0.0  ;;  %v850_v22 = vsel %vm626_vm13, %v843_v10, 0.0 }
 0x207   : > { %v861_v39 = vmul.f32 %v1822_v12, %v849_v27  ;;  %v862_v44 = vmul.f32 %v1822_v12, %v850_v22 }
 0x209   : > { %v865_v36 = vadd.f32 %v861_v39, %v828_v38  ;;  %v866_v55 = vadd.f32 %v862_v44, %v829_v13 }
 0x20b   : > { %v879_v37 = vadd.f32 %v1830_v60, %v865_v36  ;;  %v880_v14 = vadd.f32 %v1830_v60, %v866_v55 }
 0x20d   : > { %883 = vst [vmem:[%s1525_s29] sm:$0xff] %v879_v37  ;;  %884 = vst [vmem:[%s1525_s29 + $0x8] sm:$0xff] %v880_v14 }
 0x20e PF: > { %s1044_s27 = sshll.u32 %s1293_s15, 2  ;;  %s1039_s7 = sshll.u32 %s1297_s16, 3 }
 0x20f   : > { %s904_s26 = sshll.u32 %s1525_s29, 4  ;;  %s901_s9 = sadd.s32 %s1044_s27, %s1039_s7  ;;  %s1973_s26 = int_to_ptr.vmem [resolvable:$true] %s904_s26 }
 0x210   : > { %s1040_s23 = sshll.u32 %s901_s9, 7  ;;  %s888_s24 = scalar_lea.sflag [#allocation4], %s1489_s8 }
 0x211   : > { %s1978_s21 = scalar_lea.hbm %s2035_s3, %s1040_s23  ;;  %s1211_s30 = scalar_lea.vmem %s1973_s26, 512 }
 0x212   : > { %p1212_p0 = scmp.ne.s32.totalorder %s1973_s26, %s1211_s30  ;;  %p2044_p11 = scmp.ne.s32.totalorder %s2041_s28, 0 }
 0x213   : > { %s1340_s15 = smov [#allocation5]  }
 0x214   : > { %p1213_p13 = pnand %p1212_p0, %p2044_p11  ;;  %s1215_s16 = sshll.u32 %s1340_s15, 4  ;;  %s1216_s16 = int_to_ptr.vmem [resolvable:$false] %s1215_s16 }
 0x215   : > { %s1217_s29 = scalar_lea.vmem %s1216_s16, 1024  ;;  %p1218_p3 = scmp.lt.s32.totalorder %s1973_s26, %s1216_s16 }
 0x216   : > { %p1214_p1 = pneg %p1213_p13  ;;  %p1219_p5 = scmp.lt.s32.totalorder %s1217_s29, %s1211_s30 }
 0x218   : > { %p1220_p6 = por %p1219_p5, %p1218_p3 }
 0x21a   : > { %p1221_p7 = pnand %p1220_p6, %p1214_p1 }
 0x21c   : > { %1224 = shalt.err (!%p1221_p7)
}
 0x21d   : > { %s1225_s5 = scalar_lea.hbm %s1978_s21, 512  ;;  %s1229_s27 = scalar_lea.hbm %s2035_s3, 2048 }
 0x21e   : > { %p1226_p2 = scmp.ne.s32.totalorder %s1978_s21, %s1225_s5  ;;  %p1230_p9 = scmp.lt.u32.totalorder %s1978_s21, %s2035_s3 }
 0x21f   : > { %p1231_p8 = scmp.lt.u32.totalorder %s1229_s27, %s1225_s5  ;;  %p1233_p0 = scmp.lt.u32.totalorder %s1225_s5, %s1978_s21 }
 0x220   : > { %p1227_p4 = pnand %p1226_p2, %p2044_p11 }
 0x221   : > { %p1232_p12 = por %p1231_p8, %p1230_p9 }
 0x222   : > { %p1228_p10 = pneg %p1227_p4 }
 0x223   : > { %p1234_p13 = por %p1233_p0, %p1232_p12 }
 0x225   : > { %p1235_p1 = pnand %p1234_p13, %p1228_p10 }
 0x227   : > { %1238 = shalt.err (!%p1235_p1)
}
 0x228   : > { %s1341_s23 = smov 256   ;;  %s1342_s10 = smov 16  }
 0x229   : > { %1047 = dma.vmem_to_hbm [thread:$0]  (%p2044_p11), %s1973_s26, 512, %s1978_s21, %s888_s24, %s1341_s23, %s1341_s23, %s1342_s10  }
 0x22a PF: > { %p1058_p3 = scmp.ge.s32.totalorder %s1309_s19, 2  ;;  %s919_s11 = sand.u32 1, %s1281_s12  }
 0x22b   : > { %p2045_p5 = scmp.ne.s32.totalorder %s2042_s4, 0  ;;  %s920_s30 = scalar_lea.sflag [#allocation4], %s919_s11 }
 0x22d   : > { %p1054_p6 = pnand %p1058_p3, %p2045_p5 }
 0x22f   : > { %1276 = dma.done.wait (!%p1054_p6), %s920_s30, 512  }
 0x230   : > { %1278 = vsyncadd (!%p1054_p6), %s920_s30, 4294966784  ;;  %s19_s19 = sadd.s32 1, %s1309_s19   ;;  %s2046_s28 = sld [smem:[#allocation8_spill]] }
 0x231   : > { %p16_p7 = scmp.ge.s32.totalorder %s19_s19, 6   ;;  %s2047_s12 = smov %s1285_s13 }
 0x232   : > { %s2048_s13 = smov %s1289_s14  ;;  %s2049_s14 = smov %s1441_s6 }
 0x233   : > { %s2050_s15 = smov %s1301_s17  ;;  %s2051_s16 = smov %s1305_s18 }
 0x234   : > { %s2052_s17 = smov %s2055_s22  ;;  %18 = sbr.rel (!%p16_p7) target bundleno = 7 (0x7), region = 91 }
 0x236   : > { %s2053_s18 = smov %s2046_s28 }
 0x23b   :  { %925 = vsyncpa [#allocation3], 1 }
 0x23c   :  { %927 = vsyncpa [#allocation3 + $0x1], 1 }
 0x23d   :  { %928 = vsyncpa [#allocation4], 1 }
 0x23e   :  { %930 = vsyncpa [#allocation4 + $0x1], 1 }

</bundles_post_ra>
